<compile_context>
chip_gen: v5e
topology: v5e:2x2
jax: 0.10.0
libtpu: 0.0.40
codegen_flags: <defaults>
</compile_context>

<pallas_src>
import functools

import numpy as np
import jax
import jax.numpy as jnp
from jax import lax
from jax.experimental import pallas as pl
from jax.experimental.pallas import tpu as pltpu

REG_STRENGTH = 0.1


def _uniform_matching_kernel(x_row_ref, x_col_ref, out_ref, *,
                             n, n_lanes, n_rows, tb, eps):
    f32 = jnp.float32
    N, R = n_lanes, n_rows
    NEG, POS = -1e30, 1e30          # finite sentinels (Python floats, no consts)

    # ---- loop-invariant index grids, masks and tables (hoisted) -------------
    rows = lax.broadcasted_iota(jnp.int32, (R, N), 0)       # j (segment start)
    cols = lax.broadcasted_iota(jnp.int32, (R, N), 1)       # i / k (lane axis)
    lane = lax.broadcasted_iota(jnp.int32, (1, N), 1)
    rows_f = rows.astype(f32)
    cols_f = cols.astype(f32)
    lane_f = lane.astype(f32)

    valid_j = rows < n
    valid_i = cols < n
    valid_ji = valid_j & valid_i
    upper = rows <= cols                                    # j <= k
    seg_valid = upper & valid_i                             # j <= k < n
    min_mask = upper & valid_j                              # j <= i, j < n
    lane_valid = lane < n
    diag = rows == cols

    # exact per-segment mean of w: mean(w[j..k]) = (n - (j+k)/2)/eps
    mean_w = (float(n) - 0.5 * (rows_f + cols_f)) * (1.0 / eps)
    # 1/len(segment): loop-invariant -> computed once per grid step (review #8)
    seg_len = jnp.where(upper, cols - rows + 1, 1).astype(f32)
    inv_len = 1.0 / seg_len

    w_row = (float(n) - lane_f) * (1.0 / eps)               # (1, N)
    i_seq = (lane_f + 1.0) * (1.0 / float(n))               # (1, N)
    ones_col = jnp.ones((N, 1), f32)                        # MXU count reduce

    losses = []
    for t in range(tb):                                     # TB samples / step
        x_row = x_row_ref[t].astype(f32)                    # (1, N)  x[i]
        x_col = x_col_ref[t].astype(f32)                    # (R, 1)  x[j]

        # -- stable ascending-sort rank of x[j] (single comparison matrix) ----
        # j_before_i[j, i] = 1  iff  x[j] sorts strictly before x[i]
        jbi = ((x_col < x_row) | ((x_col == x_row) & (rows < cols))) & valid_ji
        # rank(j) = #{i : x[i] before x[j]} = (n-1) - #{i : x[j] before x[i]}
        before_cnt = jnp.dot(jbi.astype(f32), ones_col,
                             preferred_element_type=f32)    # (R, 1), MXU, exact
        rank_col = (float(n) - 1.0) - before_cnt            # (R, 1)

        # -- prefix sums of the (implicitly) sorted values ---------------------
        # cs_row[k] = sum of x[j] with rank(j) <= k  (inclusive prefix sum)
        cs_mask = (rank_col <= cols_f) & valid_j
        cs_row = jnp.sum(jnp.where(cs_mask, x_col, 0.0),
                         axis=0, keepdims=True)             # (1, N), exact f32
        # csm1[j] = cs_row[j-1] (0 at j = 0): one-lane shift + diagonal extract
        cs_prev = jnp.concatenate(
            [jnp.zeros((1, 1), f32), cs_row[:, :N - 1]], axis=1)   # (1, N)
        csm1_col = jnp.sum(jnp.where(diag, cs_prev, 0.0),
                           axis=1, keepdims=True)           # (R, 1)

        # -- segment means y[j..k] = mean_w (exact) + mean_x -------------------
        mean_x = (cs_row - csm1_col) * inv_len
        m = jnp.where(seg_valid, mean_w + mean_x, NEG)      # (R, N)

        # -- isotonic (non-increasing) regression via the min-max formula ------
        #   v_i = min_{j<=i} max_{k>=i} mean(y[j..k])
        # Suffix max over k (lanes) by log-step doubling.  Each step is ONE
        # lane shift (static slice + NEG fill; no wrap, no index roll) and the
        # window only has to cover the n valid lanes (review #1/#2).
        s = m
        d = 1
        while d < n:
            shifted = jnp.concatenate(
                [s[:, d:], jnp.full((R, d), NEG, f32)], axis=1)    # s[:, i+d]
            s = jnp.maximum(s, shifted)
            d *= 2
        # masked min over segment starts j <= i  ->  lane-dense (1, N) row
        v_row = jnp.min(jnp.where(min_mask, s, POS), axis=0, keepdims=True)

        # -- soft sort and the uniform-matching loss ---------------------------
        soft_sorted = v_row - w_row                         # ascending soft sort
        diff = jnp.where(lane_valid, jnp.abs(i_seq - soft_sorted), 0.0)
        losses.append(jnp.max(diff, axis=1, keepdims=True))  # (1, 1)

    # single lane-dense store of all TB losses per grid step (review #9)
    out_ref[0] = jnp.concatenate(losses, axis=1)            # (1, TB)


def uniform_matching_loss_batched(xs, *, block_batch=8):
    """Batched UniformMatchingLoss: xs is (B, n); returns (B,) losses."""
    xs = jnp.asarray(xs, jnp.float32)
    if xs.ndim != 2:
        raise ValueError("expected xs of shape (batch, n)")
    b, n = int(xs.shape[0]), int(xs.shape[1])
    if b == 0:
        return jnp.zeros((0,), jnp.float32)
    if n == 0:
        return jnp.zeros((b,), jnp.float32)

    if n > 512:
        block_batch = 1   # large working set per sample (see TODO on j-tiling)

    N = 128 * pl.cdiv(n, 128)          # lane (k/i) axis: native 128 alignment
    R = 8 * pl.cdiv(n, 8)              # sublane (j) axis: only 8-align (review #3)
    tb = min(block_batch, b)           # samples per grid step (review #9)
    g = pl.cdiv(b, tb)
    b_pad = g * tb

    xs_p = jnp.pad(xs, ((0, b_pad - b), (0, N - n)))        # (b_pad, N)
    xs_row = xs_p.reshape(b_pad, 1, N)                      # lane-major copy
    xs_col = xs_p[:, :R].reshape(b_pad, R, 1)               # sublane-major copy

    kernel = functools.partial(_uniform_matching_kernel,
                               n=n, n_lanes=N, n_rows=R, tb=tb,
                               eps=REG_STRENGTH)
    out = pl.pallas_call(
        kernel,
        out_shape=jax.ShapeDtypeStruct((g, 1, tb), jnp.float32),
        grid=(g,),
        in_specs=[pl.BlockSpec((tb, 1, N), lambda i: (i, 0, 0)),
                  pl.BlockSpec((tb, R, 1), lambda i: (i, 0, 0))],
        out_specs=pl.BlockSpec((1, 1, tb), lambda i: (i, 0, 0)),
        compiler_params=pltpu.CompilerParams(
            dimension_semantics=("parallel",),               # batch across cores
            vmem_limit_bytes=32 * 1024 * 1024),              # v7x-safe (<=64 MiB)
    )(xs_row, xs_col)
    return out.reshape(g * tb)[:b]


def uniform_matching_loss(x):
    """JAX/Pallas equivalent of UniformMatchingLoss.forward(x) (1-D x)."""
    x = jnp.asarray(x, jnp.float32)
    if int(x.shape[0]) == 0:
        return jnp.float32(0.0)
    return uniform_matching_loss_batched(x[None, :])[0]


def _reference_loss(x_np, eps=REG_STRENGTH):
    """Pure numpy reference (independent PAV-based isotonic regression)."""
    x_np = np.asarray(x_np, dtype=np.float64)
    n = x_np.shape[0]
    xa = np.sort(x_np)
    w = (n - np.arange(n)) / eps
    y = w + xa
    vals, wts = [], []
    for t in range(n):                      # PAV, non-increasing constraint
        vals.append(y[t]); wts.append(1.0)
        while len(vals) > 1 and vals[-2] < vals[-1]:
            v1, w1 = vals.pop(), wts.pop()
            v0, w0 = vals.pop(), wts.pop()
            vals.append((v0 * w0 + v1 * w1) / (w0 + w1)); wts.append(w0 + w1)
    v = np.concatenate([np.full(int(c), val) for val, c in zip(vals, wts)])
    soft = v - w
    i_seq = np.arange(1, n + 1) / n
    return float(np.max(np.abs(i_seq - soft)))


if __name__ == "__main__":
    key = jax.random.PRNGKey(0)
    k1, k2, k3 = jax.random.split(key, 3)
    n = 16

    # p-value-like inputs (the conformal-learning use case)
    x1 = jax.random.uniform(k1, (n,), dtype=jnp.float32)
    # wider-range random input
    x2 = jax.random.uniform(k2, (n,), dtype=jnp.float32) * 40.0
    # deterministic input with a large gap -> exercises the isotonic pooling
    x3 = jnp.array([0.05, 0.1, 0.12, 0.2, 0.25, 0.3, 0.31, 0.4,
                    12.0, 12.1, 12.2, 12.3, 12.35, 12.4, 12.5, 13.0],
                   dtype=jnp.float32)
    # short, non-multiple-of-8 length -> exercises index masking
    x4 = jax.random.uniform(k3, (5,), dtype=jnp.float32)

    for x in (x1, x2, x3, x4):
        loss = jax.block_until_ready(uniform_matching_loss(x))
        ref = _reference_loss(np.asarray(x))
        assert abs(float(loss) - ref) <= 1e-3 * max(1.0, abs(ref)), (float(loss), ref)

    # batched path: one pallas_call, TB samples per "parallel" grid step
    xb = jnp.stack([x1, x2, x3])
    losses = jax.block_until_ready(uniform_matching_loss_batched(xb))
    for i, x in enumerate((x1, x2, x3)):
        ref = _reference_loss(np.asarray(x))
        assert abs(float(losses[i]) - ref) <= 1e-3 * max(1.0, abs(ref)), \
            (i, float(losses[i]), ref)

    print("KERNEL_OK")
</pallas_src>

<mosaic_0001>
module attributes {stable_mosaic.version = 11 : i64} {
  func.func @_uniform_matching_kernel(%arg0: i32, %arg1: memref<1x1x128xf32, #tpu.memory_space<vmem>>, %arg2: memref<1x16x1xf32, #tpu.memory_space<vmem>>, %arg3: memref<1x1x1xf32, #tpu.memory_space<vmem>>) attributes {dimension_semantics = [#tpu.dimension_semantics<parallel>], iteration_bounds = array<i64: 1>, scalar_prefetch = 0 : i64, scratch_operands = 0 : i64, tpu.core_type = #tpu.core_type<tc>, window_params = [{transform_indices = @transform_0, window_bounds = array<i64: 1, 1, 128>}, {transform_indices = @transform_1, window_bounds = array<i64: 1, 16, 1>}, {transform_indices = @transform_2, window_bounds = array<i64: 1, 1, 1>}]} {
    %0 = tpu.iota {dimensions = array<i32: 0>} : vector<16x128xi32>
    %1 = tpu.iota {dimensions = array<i32: 1>} : vector<16x128xi32>
    %2 = tpu.iota {dimensions = array<i32: 1>} : vector<1x128xi32>
    %3 = arith.sitofp %0 : vector<16x128xi32> to vector<16x128xf32>
    %4 = arith.sitofp %1 : vector<16x128xi32> to vector<16x128xf32>
    %5 = arith.sitofp %2 : vector<1x128xi32> to vector<1x128xf32>
    %c16_i32 = arith.constant 16 : i32
    %6 = vector.broadcast %c16_i32 : i32 to vector<16x128xi32>
    %7 = arith.cmpi slt, %0, %6 : vector<16x128xi32>
    %c16_i32_0 = arith.constant 16 : i32
    %8 = vector.broadcast %c16_i32_0 : i32 to vector<16x128xi32>
    %9 = arith.cmpi slt, %1, %8 : vector<16x128xi32>
    %10 = arith.andi %7, %9 : vector<16x128xi1>
    %11 = arith.cmpi sle, %0, %1 : vector<16x128xi32>
    %12 = arith.andi %11, %9 : vector<16x128xi1>
    %13 = arith.andi %11, %7 : vector<16x128xi1>
    %c16_i32_1 = arith.constant 16 : i32
    %14 = vector.broadcast %c16_i32_1 : i32 to vector<1x128xi32>
    %15 = arith.cmpi slt, %2, %14 : vector<1x128xi32>
    %16 = arith.cmpi eq, %0, %1 : vector<16x128xi32>
    %17 = arith.addf %3, %4 : vector<16x128xf32>
    %cst = arith.constant 5.000000e-01 : f32
    %18 = vector.broadcast %cst : f32 to vector<16x128xf32>
    %19 = arith.mulf %18, %17 : vector<16x128xf32>
    %cst_2 = arith.constant 1.600000e+01 : f32
    %20 = vector.broadcast %cst_2 : f32 to vector<16x128xf32>
    %21 = arith.subf %20, %19 : vector<16x128xf32>
    %cst_3 = arith.constant 1.000000e+01 : f32
    %22 = vector.broadcast %cst_3 : f32 to vector<16x128xf32>
    %23 = arith.mulf %21, %22 : vector<16x128xf32>
    %24 = arith.subi %1, %0 : vector<16x128xi32>
    %c1_i32 = arith.constant 1 : i32
    %25 = vector.broadcast %c1_i32 : i32 to vector<16x128xi32>
    %26 = arith.addi %24, %25 : vector<16x128xi32>
    %c1_i32_4 = arith.constant 1 : i32
    %27 = vector.broadcast %c1_i32_4 : i32 to vector<16x128xi32>
    %28 = arith.select %11, %26, %27 : vector<16x128xi1>, vector<16x128xi32>
    %29 = arith.sitofp %28 : vector<16x128xi32> to vector<16x128xf32>
    %cst_5 = arith.constant 1.000000e+00 : f32
    %30 = vector.broadcast %cst_5 : f32 to vector<16x128xf32>
    %31 = arith.divf %30, %29 : vector<16x128xf32>
    %cst_6 = arith.constant 1.600000e+01 : f32
    %32 = vector.broadcast %cst_6 : f32 to vector<1x128xf32>
    %33 = arith.subf %32, %5 : vector<1x128xf32>
    %cst_7 = arith.constant 1.000000e+01 : f32
    %34 = vector.broadcast %cst_7 : f32 to vector<1x128xf32>
    %35 = arith.mulf %33, %34 : vector<1x128xf32>
    %cst_8 = arith.constant 1.000000e+00 : f32
    %36 = vector.broadcast %cst_8 : f32 to vector<1x128xf32>
    %37 = arith.addf %5, %36 : vector<1x128xf32>
    %cst_9 = arith.constant 6.250000e-02 : f32
    %38 = vector.broadcast %cst_9 : f32 to vector<1x128xf32>
    %39 = arith.mulf %37, %38 : vector<1x128xf32>
    %cst_10 = arith.constant 1.000000e+00 : f32
    %40 = vector.broadcast %cst_10 : f32 to vector<128x1xf32>
    %c0 = arith.constant 0 : index
    %c0_11 = arith.constant 0 : index
    %c0_12 = arith.constant 0 : index
    %41 = vector.load %arg1[%c0, %c0_11, %c0_12] : memref<1x1x128xf32, #tpu.memory_space<vmem>>, vector<1x1x128xf32>
    %42 = vector.shape_cast %41 : vector<1x1x128xf32> to vector<1x128xf32>
    %c0_13 = arith.constant 0 : index
    %c0_14 = arith.constant 0 : index
    %c0_15 = arith.constant 0 : index
    %43 = vector.load %arg2[%c0_13, %c0_14, %c0_15] : memref<1x16x1xf32, #tpu.memory_space<vmem>>, vector<1x16x1xf32>
    %44 = vector.shape_cast %43 : vector<1x16x1xf32> to vector<16x1xf32>
    %45 = vector.broadcast %44 : vector<16x1xf32> to vector<16x128xf32>
    %46 = vector.broadcast %42 : vector<1x128xf32> to vector<16x128xf32>
    %47 = arith.cmpf olt, %45, %46 : vector<16x128xf32>
    %48 = vector.broadcast %44 : vector<16x1xf32> to vector<16x128xf32>
    %49 = vector.broadcast %42 : vector<1x128xf32> to vector<16x128xf32>
    %50 = arith.cmpf oeq, %48, %49 : vector<16x128xf32>
    %51 = arith.cmpi slt, %0, %1 : vector<16x128xi32>
    %52 = arith.andi %50, %51 : vector<16x128xi1>
    %53 = arith.ori %47, %52 : vector<16x128xi1>
    %54 = arith.andi %53, %10 : vector<16x128xi1>
    %55 = arith.extui %54 : vector<16x128xi1> to vector<16x128xi32>
    %56 = arith.sitofp %55 : vector<16x128xi32> to vector<16x128xf32>
    %cst_16 = arith.constant dense<0.000000e+00> : vector<16x1xf32>
    %57 = tpu.matmul %56, %40, %cst_16 {dimension_numbers = #tpu.dot_dimension_numbers<[1], [0], [0], [1], [0, 0, 1, 1], [], []>} : vector<16x128xf32>, vector<128x1xf32>, vector<16x1xf32> -> vector<16x1xf32>
    %cst_17 = arith.constant 1.500000e+01 : f32
    %58 = vector.broadcast %cst_17 : f32 to vector<16x1xf32>
    %59 = arith.subf %58, %57 : vector<16x1xf32>
    %60 = vector.broadcast %59 : vector<16x1xf32> to vector<16x128xf32>
    %61 = arith.cmpf ole, %60, %4 : vector<16x128xf32>
    %62 = arith.andi %61, %7 : vector<16x128xi1>
    %cst_18 = arith.constant 0.000000e+00 : f32
    %63 = vector.shape_cast %44 : vector<16x1xf32> to vector<16x1xf32>
    %64 = vector.broadcast %63 : vector<16x1xf32> to vector<16x128xf32>
    %65 = vector.broadcast %cst_18 : f32 to vector<16x128xf32>
    %66 = arith.select %62, %64, %65 : vector<16x128xi1>, vector<16x128xf32>
    %cst_19 = arith.constant dense<0.000000e+00> : vector<128xf32>
    %67 = vector.multi_reduction <add>, %66, %cst_19 [0] : vector<16x128xf32> to vector<128xf32>
    %68 = vector.shape_cast %67 : vector<128xf32> to vector<1x128xf32>
    %cst_20 = arith.constant 0.000000e+00 : f32
    %69 = vector.broadcast %cst_20 : f32 to vector<1x1xf32>
    %70 = vector.extract_strided_slice %68 {offsets = [0, 0], sizes = [1, 127], strides = [1, 1]} : vector<1x128xf32> to vector<1x127xf32>
    %71 = tpu.concatenate %69, %70 in 1 : vector<1x1xf32>, vector<1x127xf32> -> vector<1x128xf32>
    %cst_21 = arith.constant 0.000000e+00 : f32
    %72 = vector.shape_cast %71 : vector<1x128xf32> to vector<1x128xf32>
    %73 = vector.broadcast %72 : vector<1x128xf32> to vector<16x128xf32>
    %74 = vector.broadcast %cst_21 : f32 to vector<16x128xf32>
    %75 = arith.select %16, %73, %74 : vector<16x128xi1>, vector<16x128xf32>
    %cst_22 = arith.constant dense<0.000000e+00> : vector<16xf32>
    %76 = vector.multi_reduction <add>, %75, %cst_22 [1] : vector<16x128xf32> to vector<16xf32>
    %77 = vector.shape_cast %76 : vector<16xf32> to vector<16x1xf32>
    %78 = vector.broadcast %68 : vector<1x128xf32> to vector<16x128xf32>
    %79 = vector.broadcast %77 : vector<16x1xf32> to vector<16x128xf32>
    %80 = arith.subf %78, %79 : vector<16x128xf32>
    %81 = arith.mulf %80, %31 : vector<16x128xf32>
    %82 = arith.addf %23, %81 : vector<16x128xf32>
    %cst_23 = arith.constant -1.000000e+30 : f32
    %83 = vector.broadcast %cst_23 : f32 to vector<16x128xf32>
    %84 = arith.select %12, %82, %83 : vector<16x128xi1>, vector<16x128xf32>
    %85 = vector.extract_strided_slice %84 {offsets = [0, 1], sizes = [16, 127], strides = [1, 1]} : vector<16x128xf32> to vector<16x127xf32>
    %cst_24 = arith.constant -1.000000e+30 : f32
    %86 = vector.broadcast %cst_24 : f32 to vector<16x1xf32>
    %87 = tpu.concatenate %85, %86 in 1 : vector<16x127xf32>, vector<16x1xf32> -> vector<16x128xf32>
    %88 = arith.maximumf %84, %87 : vector<16x128xf32>
    %89 = vector.extract_strided_slice %88 {offsets = [0, 2], sizes = [16, 126], strides = [1, 1]} : vector<16x128xf32> to vector<16x126xf32>
    %cst_25 = arith.constant -1.000000e+30 : f32
    %90 = vector.broadcast %cst_25 : f32 to vector<16x2xf32>
    %91 = tpu.concatenate %89, %90 in 1 : vector<16x126xf32>, vector<16x2xf32> -> vector<16x128xf32>
    %92 = arith.maximumf %88, %91 : vector<16x128xf32>
    %93 = vector.extract_strided_slice %92 {offsets = [0, 4], sizes = [16, 124], strides = [1, 1]} : vector<16x128xf32> to vector<16x124xf32>
    %cst_26 = arith.constant -1.000000e+30 : f32
    %94 = vector.broadcast %cst_26 : f32 to vector<16x4xf32>
    %95 = tpu.concatenate %93, %94 in 1 : vector<16x124xf32>, vector<16x4xf32> -> vector<16x128xf32>
    %96 = arith.maximumf %92, %95 : vector<16x128xf32>
    %97 = vector.extract_strided_slice %96 {offsets = [0, 8], sizes = [16, 120], strides = [1, 1]} : vector<16x128xf32> to vector<16x120xf32>
    %cst_27 = arith.constant -1.000000e+30 : f32
    %98 = vector.broadcast %cst_27 : f32 to vector<16x8xf32>
    %99 = tpu.concatenate %97, %98 in 1 : vector<16x120xf32>, vector<16x8xf32> -> vector<16x128xf32>
    %100 = arith.maximumf %96, %99 : vector<16x128xf32>
    %cst_28 = arith.constant 1.000000e+30 : f32
    %101 = vector.broadcast %cst_28 : f32 to vector<16x128xf32>
    %102 = arith.select %13, %100, %101 : vector<16x128xi1>, vector<16x128xf32>
    %cst_29 = arith.constant dense<0x7F800000> : vector<128xf32>
    %103 = vector.multi_reduction <minimumf>, %102, %cst_29 [0] : vector<16x128xf32> to vector<128xf32>
    %104 = vector.shape_cast %103 : vector<128xf32> to vector<1x128xf32>
    %105 = arith.subf %104, %35 : vector<1x128xf32>
    %106 = arith.subf %39, %105 : vector<1x128xf32>
    %107 = math.absf %106 : vector<1x128xf32>
    %cst_30 = arith.constant 0.000000e+00 : f32
    %108 = vector.broadcast %cst_30 : f32 to vector<1x128xf32>
    %109 = arith.select %15, %107, %108 : vector<1x128xi1>, vector<1x128xf32>
    %cst_31 = arith.constant dense<0xFF800000> : vector<1xf32>
    %110 = vector.multi_reduction <maximumf>, %109, %cst_31 [1] : vector<1x128xf32> to vector<1xf32>
    %111 = vector.shape_cast %110 : vector<1xf32> to vector<1x1xf32>
    %c0_32 = arith.constant 0 : index
    %c0_33 = arith.constant 0 : index
    %c0_34 = arith.constant 0 : index
    %112 = vector.load %arg3[%c0_32, %c0_33, %c0_34] : memref<1x1x1xf32, #tpu.memory_space<vmem>>, vector<1x1x1xf32>
    %113 = vector.shape_cast %112 : vector<1x1x1xf32> to vector<1x1xf32>
    %114 = vector.shape_cast %111 : vector<1x1xf32> to vector<1x1x1xf32>
    tpu.vector_store %arg3[%c0_32, %c0_33, %c0_34], %114 {strides = array<i32>} : memref<1x1x1xf32, #tpu.memory_space<vmem>>, vector<1x1x1xf32>,
    return
  }
  func.func @transform_0(%arg0: i32) -> (i32, i32, i32) {
    %c0_i32 = arith.constant 0 : i32
    %c0_i32_0 = arith.constant 0 : i32
    %c0_i32_1 = arith.constant 0 : i32
    return %arg0, %c0_i32, %c0_i32_0 : i32, i32, i32
  }
  func.func @transform_1(%arg0: i32) -> (i32, i32, i32) {
    %c0_i32 = arith.constant 0 : i32
    %c0_i32_0 = arith.constant 0 : i32
    %c0_i32_1 = arith.constant 0 : i32
    return %arg0, %c0_i32, %c0_i32_0 : i32, i32, i32
  }
  func.func @transform_2(%arg0: i32) -> (i32, i32, i32) {
    %c0_i32 = arith.constant 0 : i32
    %c0_i32_0 = arith.constant 0 : i32
    %c0_i32_1 = arith.constant 0 : i32
    return %arg0, %c0_i32, %c0_i32_0 : i32, i32, i32
  }
}

</mosaic_0001>

<bundles_post_ra>
// kernel: tpu_custom_call.1
= control target key start
LH: loop header
LB: loop body
LE: loop exit
PB: predicated region body
PF: predicated region fallthrough
CT: control target
= control target key end

     0   :  { %v330_v1 = vmov 0   ;;  %v331_v2 = vmov 1.0   ;;  %s433_s0 = inlined_call_operand.vmem [shape: f32[1,1,128], index: 0, kind: input, shape index: {}]   ;;  %s434_s1 = inlined_call_operand.vmem [shape: f32[1,16,1], index: 1, kind: input, shape index: {}]   ;;  %s435_s2 = inlined_call_operand.hbm [shape: f32[1,1,1], index: 2, kind: output, shape index: {}]  }
   0x1   :  { %v84_v0 = vld [vmem:[%s434_s1] sm:$0xff]  ;;  %297 = vset.pattern.permute.xlu0 %v330_v1  ;;  %115 = vmatpush.msra.mxu0 %v331_v2 }
   0x2   :  { %7 = vsyncpa [#allocation3], 0  ;;  %88 = vperm.xlu0 %297, %v84_v0   ;;  %273 = vmatpush.msra.mxu1 %v331_v2  ;;  %v85_v3 = vld [vmem:[%s434_s1 + $0x8] sm:$0xff]  ;;  %v12_v4 = vlaneseq  ;;  %v299_v7 = vld [vmem:[%s433_s0] ss:$0 sm:$0xff]  ;;  %s332_s0 = smov 1  }
   0x3   :  { %116 = vmatpush.msra.mxu0 %v331_v2  ;;  %298 = vset.pattern.permute.xlu1 %v330_v1  ;;  %vm167_vm15 = vcmask 7168   ;;  %s333_s14 = smov 127   ;;  %s334_s15 = smov 126  }
   0x4   :  { %274 = vmatpush.msra.mxu1 %v331_v2  ;;  %v359_v5 = vshrl.u32 %v12_v4, 7  ;;  %v361_v6 = vand.u32 127, %v12_v4  ;;  %s335_s16 = smov 124   ;;  %s336_s17 = smov 120  }
   0x5   :  { %117 = vmatpush.msra.mxu0 %v331_v2  ;;  %s337_s18 = smov [#allocation2]   ;;  %s260_s22 = sshll.u32 %s435_s2, 4  ;;  %s261_s22 = int_to_ptr.hbm [resolvable:$true] %s260_s22 }
   0x6   :  { %275 = vmatpush.msra.mxu1 %v331_v2  ;;  %vm103_vm0 = vcmp.lt.s32.totalorder %v359_v5, %v361_v6  ;;  %vm22_vm3 = vcmp.lt.s32.totalorder %v361_v6, 16  ;;  %v370_v9 = vadd.s32 8, %v359_v5  ;;  %v379_v16 = vcvt.s32.f32 %v361_v6  ;;  %s258_s19 = sshll.u32 %s337_s18, 4  ;;  %s259_s19 = int_to_ptr.vmem [resolvable:$true] %s258_s19 }
   0x7   :  { %118 = vmatpush.msra.mxu0 %v331_v2  ;;  %v41_v32 = vsub.s32 %v361_v6, %v359_v5  ;;  %v17_v45 = vcvt.s32.f32 %v359_v5 }
   0x8   :  { %276 = vmatpush.msra.mxu1 %v331_v2  ;;  %vm104_vm7 = vcmp.lt.s32.totalorder %v370_v9, %v361_v6  ;;  %v42_v34 = vsub.s32 %v361_v6, %v370_v9  ;;  %v18_v49 = vcvt.s32.f32 %v370_v9 }
   0x9   :  { %119 = vmatpush.msra.mxu0 %v331_v2  ;;  %v43_v33 = vadd.s32 1, %v41_v32  ;;  %v33_v48 = vadd.f32 %v379_v16, %v17_v45 }
   0xa   :  { %93 = vperm.xlu0 %297, %v85_v3   ;;  %277 = vmatpush.msra.mxu1 %v331_v2  ;;  %v44_v36 = vadd.s32 1, %v42_v34  ;;  %v34_v55 = vadd.f32 %v379_v16, %v18_v49 }
   0xb   :  { %120 = vmatpush.msra.mxu0 %v331_v2  ;;  %v35_v54 = vmul.f32 0.5, %v33_v48 }
   0xc   :  { %278 = vmatpush.msra.mxu1 %v331_v2  ;;  %v36_v62 = vmul.f32 0.5, %v34_v55 }
   0xd   :  { %121 = vmatpush.msra.mxu0 %v331_v2  ;;  %v37_v61 = vsub.f32 16.0, %v35_v54 }
   0xe   :  { %279 = vmatpush.msra.mxu1 %v331_v2 }
   0xf   :  { %122 = vmatpush.msra.mxu0 %v331_v2 }
  0x10   :  { %280 = vmatpush.msra.mxu1 %v331_v2 }
  0x11   :  { %123 = vmatpush.msra.mxu0 %v331_v2 }
  0x12   :  { %281 = vmatpush.msra.mxu1 %v331_v2 }
  0x13   :  { %124 = vmatpush.msra.mxu0 %v331_v2 }
  0x14   :  { %282 = vmatpush.msra.mxu1 %v331_v2 }
  0x15   :  { %125 = vmatpush.msra.mxu0 %v331_v2 }
  0x16   :  { %283 = vmatpush.msra.mxu1 %v331_v2 }
  0x17   :  { %126 = vmatpush.msra.mxu0 %v331_v2 }
  0x18   :  { %284 = vmatpush.msra.mxu1 %v331_v2 }
  0x19   :  { %127 = vmatpush.msra.mxu0 %v331_v2 }
  0x1a   :  { %285 = vmatpush.msra.mxu1 %v331_v2 }
  0x1b   :  { %128 = vmatpush.msra.mxu0 %v331_v2 }
  0x1c   :  { %286 = vmatpush.msra.mxu1 %v331_v2 }
  0x1d   :  { %129 = vmatpush.msra.mxu0 %v331_v2 }
  0x1e   :  { %287 = vmatpush.msra.mxu1 %v331_v2 }
  0x1f   :  { %130 = vmatpush.msra.mxu0 %v331_v2 }
  0x20   :  { %288 = vmatpush.msra.mxu1 %v331_v2 }
  0x74   :  { %v89_v8 = vpop.permute.xlu0 %88 }
  0x75   :  { %vm99_vm1 = vcmp.lt.f32.partialorder %v89_v8, %v299_v7  ;;  %vm101_vm2 = vcmp.eq.f32.partialorder %v89_v8, %v299_v7 }
  0x76   :  { %vm105_vm4 = vmand %vm101_vm2, %vm103_vm0  ;;  %vm31_vm0 = vcmp.eq.s32.totalorder %v359_v5, %v361_v6  ;;  %vm25_vm2 = vcmp.le.s32.totalorder %v359_v5, %v361_v6 }
  0x77   :  { %vm107_vm5 = vmor %vm99_vm1, %vm105_vm4  ;;  %vm32_vm1 = vcmp.eq.s32.totalorder %v370_v9, %v361_v6  ;;  %v45_v35 = vsel %vm25_vm2, %v43_v33, 1  ;;  %vm26_vm4 = vcmp.le.s32.totalorder %v370_v9, %v361_v6 }
  0x78   :  { %vm109_vm6 = vmand %vm107_vm5, %vm22_vm3  ;;  %v47_v37 = vcvt.s32.f32 %v45_v35  ;;  %v46_v38 = vsel %vm26_vm4, %v44_v36, 1 }
  0x79   :  { %271 = vmatmul.msk.f32.vlgmr.msra.gmra.mxu0 %vm109_vm6, %v331_v2  ;;  %v48_v39 = vcvt.s32.f32 %v46_v38 }
  0x7a   :  { %300 = vrcp.f32 %v47_v37  ;;  %vm54_vm5 = vweird.f32 %v47_v37  ;;  %v58_v50 = vand.u32 2147483647, %v47_v37  ;;  %v60_v51 = vand.u32 2147483648, %v47_v37 }
  0x7b   :  { %302 = vrcp.f32 %v48_v39  ;;  %v75_v57 = vand.u32 2147483648, %v48_v39  ;;  %v73_v60 = vand.u32 2147483647, %v48_v39 }
  0x7c   :  { %v94_v10 = vpop.permute.xlu0 %93  ;;  %v61_v56 = vor.u32 1.1754944e-38, %v60_v51 }
  0x7d   :  { %vm100_vm8 = vcmp.lt.f32.partialorder %v94_v10, %v299_v7  ;;  %vm102_vm9 = vcmp.eq.f32.partialorder %v94_v10, %v299_v7  ;;  %v39_v7 = vmul.f32 10.0, %v37_v61 }
  0x7e   :  { %vm106_vm10 = vmand %vm102_vm9, %vm104_vm7 }
  0x7f   :  { %vm108_vm11 = vmor %vm100_vm8, %vm106_vm10  ;;  %vm69_vm8 = vweird.f32 %v48_v39  ;;  %vm59_vm10 = vcmp.eq.f32.partialorder %v58_v50, 8.507059e+37  ;;  %v79_v50 = vsub.f32 16.0, %v379_v16 }
  0x80   :  { %vm110_vm12 = vmand %vm108_vm11, %vm22_vm3  ;;  %v301_v40 = vpop.eup %300 }
  0x81   :  { %272 = vmatmul.msk.f32.vlgmr.msra.gmra.mxu1 %vm110_vm12, %v331_v2  ;;  %v50_v41 = vmul.f32 %v301_v40, %v47_v37  ;;  %v303_v42 = vpop.eup %302  ;;  %vm55_vm6 = vweird.f32 %v301_v40  ;;  %v76_v2 = vor.u32 1.1754944e-38, %v75_v57  ;;  %vm74_vm12 = vcmp.eq.f32.partialorder %v73_v60, 8.507059e+37 }
  0x82   :  { %v65_v44 = vmul.f32 %v303_v42, %v48_v39  ;;  %vm56_vm7 = vmor %vm54_vm5, %vm55_vm6  ;;  %vm70_vm9 = vweird.f32 %v303_v42  ;;  %vm231_vm5 = vcmask 982016  }
  0x83   :  { %v51_v43 = vsub.f32 1.0, %v50_v41  ;;  %vm71_vm11 = vmor %vm69_vm8, %vm70_vm9 }
  0x84   :  { %v66_v47 = vsub.f32 1.0, %v65_v44 }
  0x85   :  { %v52_v46 = vmul.f32 %v301_v40, %v51_v43 }
  0x86   :  { %v67_v53 = vmul.f32 %v303_v42, %v66_v47 }
  0x87   :  { %v53_v52 = vadd.f32 %v301_v40, %v52_v46 }
  0x88   :  { %v68_v59 = vadd.f32 %v303_v42, %v67_v53  ;;  %v80_v53 = vmul.f32 10.0, %v79_v50 }
  0x89   :  { %v57_v58 = vsel %vm56_vm7, %v301_v40, %v53_v52  ;;  %v81_v52 = vadd.f32 1.0, %v379_v16 }
  0x8a   :  { %v62_v63 = vsel %vm59_vm10, %v61_v56, %v57_v58  ;;  %v72_v4 = vsel %vm71_vm11, %v303_v42, %v68_v59 }
  0x8b   :  { %v82_v55 = vmul.f32 0.0625, %v81_v52 }
  0xf6   :  { %v132_v11 = vpop.f32.mrf.mxu0 }
  0xf7   :  { %v138_v12 = vsub.f32 15.0, %v132_v11  ;;  %v38_v11 = vsub.f32 16.0, %v36_v62 }
  0xf9   :  { %142 = vperm.xlu1 %298, %v138_v12   ;;  %v77_v12 = vsel %vm74_vm12, %v76_v2, %v72_v4 }
  0xfe   :  { %v135_v13 = vpop.f32.mrf.mxu1 }
  0xff   :  { %v139_v14 = vsub.f32 15.0, %v135_v13 }
 0x101   :  { %147 = vperm.xlu1 %298, %v139_v14  }
 0x16b   :  { %v143_v15 = vpop.permute.xlu1 %142 }
 0x16c   :  { %vm150_vm13 = vcmp.le.f32.partialorder %v143_v15, %v379_v16 }
 0x16d   :  { %v154_v18 = vsel %vm150_vm13, %v89_v8, 0.0  ;;  %vm27_vm13 = vmand %vm25_vm2, %vm22_vm3 }
 0x173   :  { %v148_v17 = vpop.permute.xlu1 %147 }
 0x174   :  { %vm151_vm14 = vcmp.le.f32.partialorder %v148_v17, %v379_v16  ;;  %v40_v17 = vmul.f32 10.0, %v38_v11 }
 0x175   :  { %v155_v19 = vsel %vm151_vm14, %v94_v10, 0.0  ;;  %vm28_vm14 = vmand %vm26_vm4, %vm22_vm3 }
 0x176   :  { %v156_v20 = vadd.f32 %v155_v19, %v154_v18 }
 0x178   :  { %v157_v21 = vrot.slane %v156_v20, 4 }
 0x17a   :  { %v158_v22 = vadd.f32 %v157_v21, %v156_v20 }
 0x17c   :  { %v159_v23 = vrot.slane %v158_v22, 2 }
 0x17e   :  { %v160_v24 = vadd.f32 %v159_v23, %v158_v22 }
 0x180   :  { %v161_v25 = vrot.slane %v160_v24, 1 }
 0x182   :  { %v383_v26 = vadd.f32 %v161_v25, %v160_v24 }
 0x184   :  { %164 = vrot.lane.b32.xlu2 %v383_v26, %s332_s0 }
 0x1de   :  { %v165_v27 = vpop.permute.xlu2 %164 }
 0x1df   :  { %v168_v28 = vsel %vm167_vm15, 0.0, %v165_v27  ;;  %vm192_vm15 = vcmask 1039360  }
 0x1e0   :  { %v169_v29 = vperm.slane %v168_v28, 0 }
 0x1e2   :  { %v170_v30 = vsel %vm31_vm0, %v169_v29, 0.0  ;;  %v171_v31 = vsel %vm32_vm1, %v169_v29, 0.0  ;;  %vm205_vm0 = vcmask 1031168   ;;  %vm218_vm1 = vcmask 1014784  }
 0x1e3   :  { %172 = vadd.xlane.f32.xlu2 %v170_v30  ;;  %174 = vadd.xlane.f32.xlu0 %v171_v31 }
 0x256   :  { %v173_v0 = vpop.xlane.xlu2 %172  ;;  %v175_v1 = vpop.xlane.xlu0 %174 }
 0x257   :  { %v176_v3 = vsub.f32 %v383_v26, %v173_v0  ;;  %v177_v10 = vsub.f32 %v383_v26, %v175_v1 }
 0x259   :  { %v178_v8 = vmul.f32 %v176_v3, %v62_v63  ;;  %v179_v14 = vmul.f32 %v177_v10, %v77_v12 }
 0x25b   :  { %v180_v13 = vadd.f32 %v178_v8, %v39_v7  ;;  %v181_v18 = vadd.f32 %v179_v14, %v40_v17 }
 0x25d   :  { %v182_v15 = vsel %vm27_vm13, %v180_v13, -1e+30  ;;  %v183_v19 = vsel %vm28_vm14, %v181_v18, -1e+30 }
 0x25e   :  { %186 = vrot.lane.b32.xlu1 %v182_v15, %s333_s14 }
 0x266   :  { %188 = vrot.lane.b32.xlu1 %v183_v19, %s333_s14 }
 0x2d0   :  { %v187_v20 = vpop.permute.xlu1 %186 }
 0x2d1   :  { %v193_v21 = vsel %vm192_vm15, %v187_v20, -1e+30 }
 0x2d2   :  { %v195_v22 = vmax.f32 %v182_v15, %v193_v21 }
 0x2d4   :  { %199 = vrot.lane.b32.xlu1 %v195_v22, %s334_s15 }
 0x2d8   :  { %v189_v23 = vpop.permute.xlu1 %188 }
 0x2d9   :  { %v194_v24 = vsel %vm192_vm15, %v189_v23, -1e+30 }
 0x2da   :  { %v196_v25 = vmax.f32 %v183_v19, %v194_v24 }
 0x2dc   :  { %201 = vrot.lane.b32.xlu1 %v196_v25, %s334_s15 }
 0x346   :  { %v200_v26 = vpop.permute.xlu1 %199 }
 0x347   :  { %v206_v27 = vsel %vm205_vm0, %v200_v26, -1e+30 }
 0x348   :  { %v208_v28 = vmax.f32 %v195_v22, %v206_v27 }
 0x34a   :  { %212 = vrot.lane.b32.xlu1 %v208_v28, %s335_s16 }
 0x34e   :  { %v202_v29 = vpop.permute.xlu1 %201 }
 0x34f   :  { %v207_v30 = vsel %vm205_vm0, %v202_v29, -1e+30 }
 0x350   :  { %v209_v31 = vmax.f32 %v196_v25, %v207_v30 }
 0x352   :  { %214 = vrot.lane.b32.xlu2 %v209_v31, %s335_s16 }
 0x3ac   :  { %v215_v32 = vpop.permute.xlu2 %214 }
 0x3ad   :  { %v220_v33 = vsel %vm218_vm1, %v215_v32, -1e+30 }
 0x3ae   :  { %v222_v34 = vmax.f32 %v209_v31, %v220_v33 }
 0x3b0   :  { %227 = vrot.lane.b32.xlu0 %v222_v34, %s336_s17 }
 0x3bc   :  { %v213_v35 = vpop.permute.xlu1 %212 }
 0x3bd   :  { %v219_v36 = vsel %vm218_vm1, %v213_v35, -1e+30 }
 0x3be   :  { %v221_v37 = vmax.f32 %v208_v28, %v219_v36 }
 0x3c0   :  { %225 = vrot.lane.b32.xlu1 %v221_v37, %s336_s17 }
 0x422   :  { %v228_v38 = vpop.permute.xlu0 %227 }
 0x423   :  { %v233_v39 = vsel %vm231_vm5, %v228_v38, -1e+30 }
 0x424   :  { %v235_v40 = vmax.f32 %v222_v34, %v233_v39 }
 0x426   :  { %v237_v44 = vsel %vm26_vm4, %v235_v40, 1e+30 }
 0x432   :  { %v226_v41 = vpop.permute.xlu1 %225 }
 0x433   :  { %v232_v42 = vsel %vm231_vm5, %v226_v41, -1e+30 }
 0x434   :  { %v234_v43 = vmax.f32 %v221_v37, %v232_v42 }
 0x436   :  { %v236_v45 = vsel %vm25_vm2, %v234_v43, 1e+30  ;;  %vm251_vm2 = vcmask 0  }
 0x437   :  { %v238_v46 = vmin.f32 %v236_v45, %v237_v44 }
 0x439   :  { %v239_v47 = vrot.slane %v238_v46, 4 }
 0x43b   :  { %v240_v48 = vmin.f32 %v238_v46, %v239_v47 }
 0x43d   :  { %v241_v49 = vrot.slane %v240_v48, 2 }
 0x43f   :  { %v242_v51 = vmin.f32 %v240_v48, %v241_v49 }
 0x441   :  { %v243_v54 = vrot.slane %v242_v51, 1 }
 0x443   :  { %v244_v56 = vmin.f32 %v242_v51, %v243_v54 }
 0x445   :  { %v245_v57 = vsub.f32 %v244_v56, %v80_v53 }
 0x447   :  { %v246_v9 = vsub.f32 %v82_v55, %v245_v57 }
 0x449   :  { %v247_v58 = vand.u32 2147483647, %v246_v9 }
 0x44b   :  { %v248_v5 = vsel %vm22_vm3, %v247_v58, 0.0 }
 0x44c   :  { %249 = vmax.xlane.f32.xlu1 %v248_v5 }
 0x4bf   :  { %v250_v16 = vpop.xlane.xlu1 %249 }
 0x4c0   :  { %252 = vst.msk [vmem:[#allocation2] sm:$0x1] %vm251_vm2, %v250_v16 }
 0x4c1   :  { %263 = dma.vmem_to_hbm [thread:$0]  %s259_s19, 16, %s261_s22, [#allocation3]  }
 0x4c2   :  { %328 = dma.done.wait [#allocation3], 16  }
 0x4c3   :  { %329 = vsyncadd [#allocation3], 4294967280 }
 0x4c4   :  { %268 = vsyncpa [#allocation3], 1 }

</bundles_post_ra>
